<compile_context>
chip_gen: v6e
topology: v6e:2x2x1
jax: 0.10.0
libtpu: 0.0.40
codegen_flags: <defaults>
</compile_context>

<pallas_src>
import jax
import jax.numpy as jnp
from jax.experimental import pallas as pl
from jax.experimental.pallas import tpu as pltpu


# --------------------------- Pallas conv kernel ----------------------------- #
def _conv_matmul_kernel(p_ref, w_ref, o_ref):
    # p_ref: (1, KP, HW)  im2col patches for one image (HW on lanes, dense)
    # w_ref: (Cout, KP)   flattened conv weight, K zero-padded to KP
    # o_ref: (1, Cout, HW)
    # NOTE: default MXU precision is well within the 1e-2 tolerance here
    # (K = 27, unit-scale data); kept deliberately instead of HIGHEST.
    o_ref[0] = jnp.dot(w_ref[...], p_ref[0],
                       preferred_element_type=jnp.float32)


def conv3x3_same(x, w):
    """Conv2d(Cin->Cout, k=3, s=1, p=1, bias=False); NCHW in / NCHW out."""
    N, Cin, H, W = x.shape
    Cout = w.shape[0]
    HW = H * W
    K = Cin * 9
    KP = 32 if K <= 32 else ((K + 7) // 8) * 8      # pad contraction dim

    # --- im2col (tiny XLA prep, fuses into one small op) --------------------
    # pat[n, ci*9 + kh*3 + kw, h*W + w] = xpad[n, ci, h+kh, w+kw]
    xp = jnp.pad(x, ((0, 0), (0, 0), (1, 1), (1, 1)))
    cols = [xp[:, :, kh:kh + H, kw:kw + W]
            for kh in range(3) for kw in range(3)]
    pat = jnp.stack(cols, axis=2)                          # (N, Cin, 9, H, W)
    pat = pat.reshape(N, K, HW)                            # (N, K, H*W)
    pat = jnp.pad(pat, ((0, 0), (0, KP - K), (0, 0)))      # (N, KP, H*W)
    wmat = jnp.pad(w.reshape(Cout, K).astype(jnp.float32),
                   ((0, 0), (0, KP - K)))                  # (Cout, KP)

    out = pl.pallas_call(
        _conv_matmul_kernel,
        out_shape=jax.ShapeDtypeStruct((N, Cout, HW), jnp.float32),
        grid=(N,),
        in_specs=[
            pl.BlockSpec((1, KP, HW), lambda n: (n, 0, 0)),
            pl.BlockSpec((Cout, KP), lambda n: (0, 0)),
        ],
        out_specs=pl.BlockSpec((1, Cout, HW), lambda n: (n, 0, 0)),
        compiler_params=pltpu.CompilerParams(
            dimension_semantics=("parallel",)),
        cost_estimate=pl.CostEstimate(
            flops=2 * N * Cout * KP * HW,
            transcendentals=0,
            bytes_accessed=4 * (N * KP * HW + Cout * KP + N * Cout * HW)),
    )(pat, wmat)

    # Free row-major reshape back to NCHW (no data movement).
    return out.reshape(N, Cout, H, W)


@jax.jit
def model_forward(x, w):
    return conv3x3_same(x, w)


# --------------------------------- main ------------------------------------ #
if __name__ == "__main__":
    key = jax.random.PRNGKey(0)
    k1, k2 = jax.random.split(key)
    N, Cin, H, W = 2, 3, 32, 32
    Cout = 32
    x = jax.random.normal(k1, (N, Cin, H, W), dtype=jnp.float32)
    w = jax.random.normal(k2, (Cout, Cin, 3, 3), dtype=jnp.float32) * 0.1

    out = model_forward(x, w)
    jax.block_until_ready(out)

    # Reference: XLA convolution at highest precision.
    ref = jax.lax.conv_general_dilated(
        x, w, window_strides=(1, 1), padding=((1, 1), (1, 1)),
        dimension_numbers=("NCHW", "OIHW", "NCHW"),
        precision=jax.lax.Precision.HIGHEST)

    assert out.shape == (N, Cout, H, W), out.shape
    max_err = float(jnp.max(jnp.abs(out - ref)))
    assert jnp.allclose(out, ref, atol=1e-2, rtol=1e-2), max_err
    print("KERNEL_OK")
</pallas_src>

<mosaic_0001>
module attributes {stable_mosaic.version = 11 : i64} {
  func.func @_conv_matmul_kernel(%arg0: i32, %arg1: memref<1x32x1024xf32, #tpu.memory_space<vmem>>, %arg2: memref<32x32xf32, #tpu.memory_space<vmem>>, %arg3: memref<1x32x1024xf32, #tpu.memory_space<vmem>>) attributes {dimension_semantics = [#tpu.dimension_semantics<parallel>], iteration_bounds = array<i64: 2>, scalar_prefetch = 0 : i64, scratch_operands = 0 : i64, tpu.core_type = #tpu.core_type<tc>, window_params = [{transform_indices = @transform_0, window_bounds = array<i64: 1, 32, 1024>}, {pipeline_mode = #tpu.pipeline_mode<synchronous>, transform_indices = @transform_1, window_bounds = array<i64: 32, 32>}, {transform_indices = @transform_2, window_bounds = array<i64: 1, 32, 1024>}]} {
    %c0 = arith.constant 0 : index
    %c0_0 = arith.constant 0 : index
    %0 = vector.load %arg2[%c0, %c0_0] : memref<32x32xf32, #tpu.memory_space<vmem>>, vector<32x32xf32>
    %c0_1 = arith.constant 0 : index
    %c0_2 = arith.constant 0 : index
    %c0_3 = arith.constant 0 : index
    %1 = vector.load %arg1[%c0_1, %c0_2, %c0_3] : memref<1x32x1024xf32, #tpu.memory_space<vmem>>, vector<1x32x1024xf32>
    %2 = vector.shape_cast %1 : vector<1x32x1024xf32> to vector<32x1024xf32>
    %cst = arith.constant dense<0.000000e+00> : vector<32x1024xf32>
    %3 = tpu.matmul %0, %2, %cst {dimension_numbers = #tpu.dot_dimension_numbers<[1], [0], [0], [1], [0, 0, 1, 1], [], []>} : vector<32x32xf32>, vector<32x1024xf32>, vector<32x1024xf32> -> vector<32x1024xf32>
    %c0_4 = arith.constant 0 : index
    %c0_5 = arith.constant 0 : index
    %c0_6 = arith.constant 0 : index
    %4 = vector.load %arg3[%c0_4, %c0_5, %c0_6] : memref<1x32x1024xf32, #tpu.memory_space<vmem>>, vector<1x32x1024xf32>
    %5 = vector.shape_cast %4 : vector<1x32x1024xf32> to vector<32x1024xf32>
    %6 = vector.shape_cast %3 : vector<32x1024xf32> to vector<1x32x1024xf32>
    tpu.vector_store %arg3[%c0_4, %c0_5, %c0_6], %6 {strides = array<i32>} : memref<1x32x1024xf32, #tpu.memory_space<vmem>>, vector<1x32x1024xf32>,
    return
  }
  func.func @transform_0(%arg0: i32) -> (i32, i32, i32) {
    %c0_i32 = arith.constant 0 : i32
    %c0_i32_0 = arith.constant 0 : i32
    %c0_i32_1 = arith.constant 0 : i32
    return %arg0, %c0_i32, %c0_i32_0 : i32, i32, i32
  }
  func.func @transform_1(%arg0: i32) -> (i32, i32) {
    %c0_i32 = arith.constant 0 : i32
    %c0_i32_0 = arith.constant 0 : i32
    %c0_i32_1 = arith.constant 0 : i32
    return %c0_i32, %c0_i32_0 : i32, i32
  }
  func.func @transform_2(%arg0: i32) -> (i32, i32, i32) {
    %c0_i32 = arith.constant 0 : i32
    %c0_i32_0 = arith.constant 0 : i32
    %c0_i32_1 = arith.constant 0 : i32
    return %arg0, %c0_i32, %c0_i32_0 : i32, i32, i32
  }
}

</mosaic_0001>

<bundles_post_ra>
// kernel: model_forward.1
= control target key start
LH: loop header
LB: loop body
LE: loop exit
PB: predicated region body
PF: predicated region fallthrough
CT: control target
= control target key end

     0   :  { %s698_s9 = smov 0   ;;  %s834_s0 = inlined_call_operand.vmem [shape: f32[2,32,1024], index: 0, kind: input, shape index: {}]   ;;  %s835_s1 = inlined_call_operand.vmem [shape: f32[32,32], index: 1, kind: input, shape index: {}]   ;;  %s836_s2 = inlined_call_operand.vmem [shape: f32[2,32,1024], index: 2, kind: output, shape index: {}]  }
   0x1 LB: > { %s636_s10 = sadd.s32 4294967295, %s680_s9   ;;  %p640_p0 = scmp.ge.s32.totalorder %s680_s9, 1  ;;  %s680_s9 = sphi %s698_s9, %s12_s9  }
   0x2   : > { %p112_p1 = scmp.lt.s32.totalorder %s680_s9, 3 }
   0x4   : > { %p113_p2 = pnand %p640_p0, %p112_p1 }
   0x5   : > { %p134_p3 = scmp.lt.s32.totalorder (!%p113_p2), %s636_s10, 1 }
   0x6   : > { %116 = sbr.rel (%p113_p2) target bundleno = 247 (0xf7), region = 28 }
   0xb   : > { %v682_v0 = vmov 0.0   ;;  %s838_s10 = smov (!%p134_p3, %s636_s10), 1  ;;  %v144_v17 = vld [vmem:[%s835_s1] sm:$0xff]  ;;  %vm180_vm0 = vcmask 261120   ;;  %v145_v22 = vld [vmem:[%s835_s1 + $0x8] sm:$0xff]  ;;  %v146_v27 = vld [vmem:[%s835_s1 + $0x10] sm:$0xff] }
   0xc   : > { %257 = vmatprep.mubr.f32.mxu0 %v682_v0  ;;  %346 = vmatprep.mubr.f32.mxu1 %v682_v0  ;;  %s663_s11 = sshll.u32 %s838_s10, 8  ;;  %v147_v32 = vld [vmem:[%s835_s1 + $0x18] sm:$0xff] }
   0xd   : > { %s716_s14 = scalar_lea.vmem %s834_s0, %s663_s11  ;;  %s797_s25 = scalar_lea.vmem %s836_s2, %s663_s11 }
   0xe   : > { %v173_v1 = vld [vmem:[%s716_s14 + $0xc8] sm:$0xff]  ;;  %v175_v2 = vld [vmem:[%s716_s14 + $0xd8] sm:$0xff]  ;;  %v172_v3 = vld [vmem:[%s716_s14 + $0xc0] sm:$0xff] }
   0xf   : > { %217 = vmatprep.subr.mxu0 %v173_v1  ;;  %306 = vmatprep.subr.mxu1 %v175_v2  ;;  %v174_v4 = vld [vmem:[%s716_s14 + $0xd0] sm:$0xff]  ;;  %v165_v5 = vld [vmem:[%s716_s14 + $0x88] sm:$0xff]  ;;  %v167_v6 = vld [vmem:[%s716_s14 + $0x98] sm:$0xff] }
  0x10   : > { %218 = vmatpush1.msra.mxu0 %v172_v3  ;;  %307 = vmatpush1.msra.mxu1 %v174_v4  ;;  %v164_v7 = vld [vmem:[%s716_s14 + $0x80] sm:$0xff]  ;;  %v166_v8 = vld [vmem:[%s716_s14 + $0x90] sm:$0xff]  ;;  %v157_v9 = vld [vmem:[%s716_s14 + $0x48] sm:$0xff] }
  0x11   : > { %219 = vmatprep.subr.mxu0 %v165_v5  ;;  %308 = vmatprep.subr.mxu1 %v167_v6  ;;  %v159_v10 = vld [vmem:[%s716_s14 + $0x58] sm:$0xff]  ;;  %v156_v11 = vld [vmem:[%s716_s14 + $0x40] sm:$0xff]  ;;  %v158_v12 = vld [vmem:[%s716_s14 + $0x50] sm:$0xff] }
  0x12   : > { %220 = vmatpush1.msra.mxu0 %v164_v7  ;;  %309 = vmatpush1.msra.mxu1 %v166_v8  ;;  %v149_v13 = vld [vmem:[%s716_s14 + $0x8] sm:$0xff]  ;;  %v151_v14 = vld [vmem:[%s716_s14 + $0x18] sm:$0xff]  ;;  %v148_v15 = vld [vmem:[%s716_s14] sm:$0xff] }
  0x13   : > { %221 = vmatprep.subr.mxu0 %v157_v9  ;;  %310 = vmatprep.subr.mxu1 %v159_v10  ;;  %v150_v16 = vld [vmem:[%s716_s14 + $0x10] sm:$0xff]  ;;  %v177_v18 = vld [vmem:[%s716_s14 + $0xe8] sm:$0xff]  ;;  %v179_v19 = vld [vmem:[%s716_s14 + $0xf8] sm:$0xff] }
  0x14   : > { %222 = vmatpush1.msra.mxu0 %v156_v11  ;;  %311 = vmatpush1.msra.mxu1 %v158_v12  ;;  %v176_v20 = vld [vmem:[%s716_s14 + $0xe0] sm:$0xff]  ;;  %v178_v21 = vld [vmem:[%s716_s14 + $0xf0] sm:$0xff]  ;;  %v169_v23 = vld [vmem:[%s716_s14 + $0xa8] sm:$0xff] }
  0x15   : > { %223 = vmatprep.subr.mxu0 %v149_v13  ;;  %312 = vmatprep.subr.mxu1 %v151_v14  ;;  %v171_v24 = vld [vmem:[%s716_s14 + $0xb8] sm:$0xff]  ;;  %v168_v25 = vld [vmem:[%s716_s14 + $0xa0] sm:$0xff]  ;;  %v170_v26 = vld [vmem:[%s716_s14 + $0xb0] sm:$0xff] }
  0x16   : > { %224 = vmatpush1.msra.mxu0 %v148_v15  ;;  %313 = vmatpush1.msra.mxu1 %v150_v16  ;;  %v161_v28 = vld [vmem:[%s716_s14 + $0x68] sm:$0xff]  ;;  %v163_v29 = vld [vmem:[%s716_s14 + $0x78] sm:$0xff]  ;;  %v160_v30 = vld [vmem:[%s716_s14 + $0x60] sm:$0xff] }
  0x17   : > { %645 = vmatmul.mubr.msk.f32.vlgmr.msra.gmra.mxu0 %vm180_vm0, %v144_v17  ;;  %649 = vmatmul.mubr.msk.f32.vlgmr.msra.gmra.mxu1 %vm180_vm0, %v144_v17  ;;  %v162_v31 = vld [vmem:[%s716_s14 + $0x70] sm:$0xff]  ;;  %v153_v33 = vld [vmem:[%s716_s14 + $0x28] sm:$0xff]  ;;  %v155_v34 = vld [vmem:[%s716_s14 + $0x38] sm:$0xff] }
  0x18   : > { %395 = vmatprep.subr.mxu0 %v177_v18  ;;  %484 = vmatprep.subr.mxu1 %v179_v19  ;;  %v152_v35 = vld [vmem:[%s716_s14 + $0x20] sm:$0xff]  ;;  %v154_v36 = vld [vmem:[%s716_s14 + $0x30] sm:$0xff] }
  0x19   : > { %396 = vmatpush1.msra.mxu0 %v176_v20  ;;  %485 = vmatpush1.msra.mxu1 %v178_v21 }
  0x1a   : > { %263 = vmatprep.mubr.f32.mxu0 %v682_v0  ;;  %352 = vmatprep.mubr.f32.mxu1 %v682_v0 }
  0x1b   : > { %646 = vmatmul.mubr.msk.f32.gmra.mxu0 %vm180_vm0, %v145_v22  ;;  %650 = vmatmul.mubr.msk.f32.gmra.mxu1 %vm180_vm0, %v145_v22 }
  0x1c   : > { %397 = vmatprep.subr.mxu0 %v169_v23  ;;  %486 = vmatprep.subr.mxu1 %v171_v24 }
  0x1d   : > { %398 = vmatpush1.msra.mxu0 %v168_v25  ;;  %487 = vmatpush1.msra.mxu1 %v170_v26 }
  0x1e   : > { %269 = vmatprep.mubr.f32.mxu0 %v682_v0  ;;  %358 = vmatprep.mubr.f32.mxu1 %v682_v0 }
  0x1f   : > { %647 = vmatmul.mubr.msk.f32.gmra.mxu0 %vm180_vm0, %v146_v27  ;;  %651 = vmatmul.mubr.msk.f32.gmra.mxu1 %vm180_vm0, %v146_v27 }
  0x20   : > { %399 = vmatprep.subr.mxu0 %v161_v28  ;;  %488 = vmatprep.subr.mxu1 %v163_v29 }
  0x21   : > { %400 = vmatpush1.msra.mxu0 %v160_v30  ;;  %489 = vmatpush1.msra.mxu1 %v162_v31 }
  0x22   : > { %275 = vmatprep.mubr.f32.mxu0 %v682_v0  ;;  %364 = vmatprep.mubr.f32.mxu1 %v682_v0 }
  0x23   : > { %648 = vmatmul.mubr.msk.f32.gmra.mxu0 %vm180_vm0, %v147_v32  ;;  %652 = vmatmul.mubr.msk.f32.gmra.mxu1 %vm180_vm0, %v147_v32 }
  0x24   : > { %401 = vmatprep.subr.mxu0 %v153_v33  ;;  %490 = vmatprep.subr.mxu1 %v155_v34 }
  0x25   : > { %402 = vmatpush1.msra.mxu0 %v152_v35  ;;  %491 = vmatpush1.msra.mxu1 %v154_v36 }
  0x26   : > { %435 = vmatprep.mubr.f32.mxu0 %v682_v0  ;;  %524 = vmatprep.mubr.f32.mxu1 %v682_v0 }
  0x27   : > { %653 = vmatmul.mubr.msk.f32.vlgmr.msra.gmra.mxu0 %vm180_vm0, %v144_v17  ;;  %657 = vmatmul.mubr.msk.f32.vlgmr.msra.gmra.mxu1 %vm180_vm0, %v144_v17 }
  0x28   : > { %441 = vmatprep.mubr.f32.mxu0 %v682_v0  ;;  %530 = vmatprep.mubr.f32.mxu1 %v682_v0 }
  0x2b   : > { %654 = vmatmul.mubr.msk.f32.gmra.mxu0 %vm180_vm0, %v145_v22  ;;  %658 = vmatmul.mubr.msk.f32.gmra.mxu1 %vm180_vm0, %v145_v22 }
  0x2c   : > { %447 = vmatprep.mubr.f32.mxu0 %v682_v0  ;;  %536 = vmatprep.mubr.f32.mxu1 %v682_v0 }
  0x2f   : > { %655 = vmatmul.mubr.msk.f32.gmra.mxu0 %vm180_vm0, %v146_v27  ;;  %659 = vmatmul.mubr.msk.f32.gmra.mxu1 %vm180_vm0, %v146_v27 }
  0x30   : > { %453 = vmatprep.mubr.f32.mxu0 %v682_v0  ;;  %542 = vmatprep.mubr.f32.mxu1 %v682_v0 }
  0x33   : > { %656 = vmatmul.mubr.msk.f32.gmra.mxu0 %vm180_vm0, %v147_v32  ;;  %660 = vmatmul.mubr.msk.f32.gmra.mxu1 %vm180_vm0, %v147_v32 }
  0xd7   : > { %v259_v37 = vpop.f32.mrf.mxu0  ;;  %v348_v38 = vpop.f32.mrf.mxu1 }
  0xd8   : > { %549 = vst [vmem:[%s797_s25] sm:$0xff] %v259_v37  ;;  %551 = vst [vmem:[%s797_s25 + $0x10] sm:$0xff] %v348_v38 }
  0xd9   : > { %v261_v39 = vpop.f32.mrf.mxu0  ;;  %v350_v40 = vpop.f32.mrf.mxu1 }
  0xda   : > { %550 = vst [vmem:[%s797_s25 + $0x8] sm:$0xff] %v261_v39  ;;  %552 = vst [vmem:[%s797_s25 + $0x18] sm:$0xff] %v350_v40 }
  0xdb   : > { %v265_v41 = vpop.f32.mrf.mxu0  ;;  %v354_v42 = vpop.f32.mrf.mxu1 }
  0xdc   : > { %557 = vst [vmem:[%s797_s25 + $0x40] sm:$0xff] %v265_v41  ;;  %559 = vst [vmem:[%s797_s25 + $0x50] sm:$0xff] %v354_v42 }
  0xdd   : > { %v267_v43 = vpop.f32.mrf.mxu0  ;;  %v356_v44 = vpop.f32.mrf.mxu1 }
  0xde   : > { %558 = vst [vmem:[%s797_s25 + $0x48] sm:$0xff] %v267_v43  ;;  %560 = vst [vmem:[%s797_s25 + $0x58] sm:$0xff] %v356_v44 }
  0xdf   : > { %v271_v45 = vpop.f32.mrf.mxu0  ;;  %v360_v46 = vpop.f32.mrf.mxu1 }
  0xe0   : > { %565 = vst [vmem:[%s797_s25 + $0x80] sm:$0xff] %v271_v45  ;;  %567 = vst [vmem:[%s797_s25 + $0x90] sm:$0xff] %v360_v46 }
  0xe1   : > { %v273_v47 = vpop.f32.mrf.mxu0  ;;  %v362_v48 = vpop.f32.mrf.mxu1 }
  0xe2   : > { %566 = vst [vmem:[%s797_s25 + $0x88] sm:$0xff] %v273_v47  ;;  %568 = vst [vmem:[%s797_s25 + $0x98] sm:$0xff] %v362_v48 }
  0xe3   : > { %v277_v49 = vpop.f32.mrf.mxu0  ;;  %v366_v50 = vpop.f32.mrf.mxu1 }
  0xe4   : > { %573 = vst [vmem:[%s797_s25 + $0xc0] sm:$0xff] %v277_v49  ;;  %575 = vst [vmem:[%s797_s25 + $0xd0] sm:$0xff] %v366_v50 }
  0xe5   : > { %v279_v51 = vpop.f32.mrf.mxu0  ;;  %v368_v52 = vpop.f32.mrf.mxu1 }
  0xe6   : > { %574 = vst [vmem:[%s797_s25 + $0xc8] sm:$0xff] %v279_v51  ;;  %576 = vst [vmem:[%s797_s25 + $0xd8] sm:$0xff] %v368_v52 }
  0xe7   : > { %v437_v53 = vpop.f32.mrf.mxu0  ;;  %v526_v54 = vpop.f32.mrf.mxu1 }
  0xe8   : > { %553 = vst [vmem:[%s797_s25 + $0x20] sm:$0xff] %v437_v53  ;;  %555 = vst [vmem:[%s797_s25 + $0x30] sm:$0xff] %v526_v54 }
  0xe9   : > { %v439_v55 = vpop.f32.mrf.mxu0  ;;  %v528_v56 = vpop.f32.mrf.mxu1 }
  0xea   : > { %554 = vst [vmem:[%s797_s25 + $0x28] sm:$0xff] %v439_v55  ;;  %556 = vst [vmem:[%s797_s25 + $0x38] sm:$0xff] %v528_v56 }
  0xeb   : > { %v443_v57 = vpop.f32.mrf.mxu0  ;;  %v532_v58 = vpop.f32.mrf.mxu1 }
  0xec   : > { %561 = vst [vmem:[%s797_s25 + $0x60] sm:$0xff] %v443_v57  ;;  %563 = vst [vmem:[%s797_s25 + $0x70] sm:$0xff] %v532_v58 }
  0xed   : > { %v445_v59 = vpop.f32.mrf.mxu0  ;;  %v534_v60 = vpop.f32.mrf.mxu1 }
  0xee   : > { %562 = vst [vmem:[%s797_s25 + $0x68] sm:$0xff] %v445_v59  ;;  %564 = vst [vmem:[%s797_s25 + $0x78] sm:$0xff] %v534_v60 }
  0xef   : > { %v449_v61 = vpop.f32.mrf.mxu0  ;;  %v538_v62 = vpop.f32.mrf.mxu1 }
  0xf0   : > { %569 = vst [vmem:[%s797_s25 + $0xa0] sm:$0xff] %v449_v61  ;;  %571 = vst [vmem:[%s797_s25 + $0xb0] sm:$0xff] %v538_v62 }
  0xf1   : > { %v451_v63 = vpop.f32.mrf.mxu0  ;;  %v540_v0 = vpop.f32.mrf.mxu1 }
  0xf2   : > { %570 = vst [vmem:[%s797_s25 + $0xa8] sm:$0xff] %v451_v63  ;;  %572 = vst [vmem:[%s797_s25 + $0xb8] sm:$0xff] %v540_v0 }
  0xf3   : > { %v455_v1 = vpop.f32.mrf.mxu0  ;;  %v544_v2 = vpop.f32.mrf.mxu1 }
  0xf4   : > { %577 = vst [vmem:[%s797_s25 + $0xe0] sm:$0xff] %v455_v1  ;;  %579 = vst [vmem:[%s797_s25 + $0xf0] sm:$0xff] %v544_v2 }
  0xf5   : > { %v457_v3 = vpop.f32.mrf.mxu0  ;;  %v546_v4 = vpop.f32.mrf.mxu1 }
  0xf6   : > { %578 = vst [vmem:[%s797_s25 + $0xe8] sm:$0xff] %v457_v3  ;;  %580 = vst [vmem:[%s797_s25 + $0xf8] sm:$0xff] %v546_v4 }
  0xf7 PF: > { %s12_s9 = sadd.s32 1, %s680_s9  }
  0xf8   : > { %p9_p4 = scmp.ge.s32.totalorder %s12_s9, 4  }
  0xfa   :  { %11 = sbr.rel (!%p9_p4) target bundleno = 1 (0x1), region = 58 }

</bundles_post_ra>
